<compile_context>
chip_gen: v7x
topology: tpu7x:2x2x1
jax: 0.10.0
libtpu: 0.0.40
codegen_flags: <defaults>
</compile_context>

<pallas_src>
import jax
import jax.numpy as jnp
from jax.experimental import pallas as pl
from jax.experimental.pallas import tpu as pltpu


def _bmm_kernel(lhs_ref, rhs_ref, out_ref):
    # lhs_ref: (bt, M, K), rhs_ref: (bt, K, N), out_ref: (bt, M, N)
    out_ref[...] = jnp.einsum(
        "bmk,bkn->bmn",
        lhs_ref[...],
        rhs_ref[...],
        preferred_element_type=jnp.float32,
    ).astype(out_ref.dtype)


def _pick_batch_tile(B, M, K, N, dtype_bytes=4):
    """Largest divisor of B fitting a small VMEM budget, preferring >=2 grid steps."""
    # Double-buffered inputs + output per grid step.
    per_batch = (M * K + K * N + M * N) * dtype_bytes * 2
    vmem_budget = 8 * 1024 * 1024  # conservative: fits v5e/v6e/v7x scoped VMEM
    max_bt = max(1, vmem_budget // max(per_batch, 1))
    divisors = [d for d in range(1, B + 1) if B % d == 0 and d <= max_bt]
    multi_step = [d for d in divisors if B // d >= 2]
    return max(multi_step) if multi_step else max(divisors)


@jax.jit
def matmul_4d(lhs: jax.Array, rhs: jax.Array) -> jax.Array:
    """Pallas equivalent of torch.matmul for 4-D inputs (batched matmul)."""
    assert lhs.ndim == 4 and rhs.ndim == 4
    B0, B1, M, K = lhs.shape
    rb0, rb1, K2, N = rhs.shape
    assert (B0, B1) == (rb0, rb1), "batch dims must match"
    assert K == K2, "contraction dims must match"

    B = B0 * B1
    lhs3 = lhs.reshape(B, M, K)
    rhs3 = rhs.reshape(B, K, N)

    bt = _pick_batch_tile(B, M, K, N)
    grid = (B // bt,)

    out = pl.pallas_call(
        _bmm_kernel,
        out_shape=jax.ShapeDtypeStruct((B, M, N), lhs.dtype),
        grid_spec=pl.GridSpec(
            grid=grid,
            in_specs=[
                pl.BlockSpec((bt, M, K), lambda i: (i, 0, 0)),
                pl.BlockSpec((bt, K, N), lambda i: (i, 0, 0)),
            ],
            out_specs=pl.BlockSpec((bt, M, N), lambda i: (i, 0, 0)),
        ),
        compiler_params=pltpu.CompilerParams(
            dimension_semantics=("parallel",),  # batch axis: megacore on v7x
        ),
    )(lhs3, rhs3)

    return out.reshape(B0, B1, M, N)


if __name__ == "__main__":
    key = jax.random.PRNGKey(0)
    k1, k2 = jax.random.split(key)
    # Static shapes from the module's annotate_args.
    lhs = jax.random.normal(k1, (4, 5, 6, 7), dtype=jnp.float32)
    rhs = jax.random.normal(k2, (4, 5, 7, 6), dtype=jnp.float32)

    out = matmul_4d(lhs, rhs)
    jax.block_until_ready(out)

    # Pure-JAX reference (same semantics as torch.matmul on 4-D tensors).
    ref = jnp.matmul(lhs, rhs)
    assert out.shape == (4, 5, 6, 6), out.shape
    assert jnp.allclose(out, ref, rtol=1e-5, atol=1e-5), float(
        jnp.max(jnp.abs(out - ref))
    )

    print("KERNEL_OK")
</pallas_src>

<mosaic_0001>
module attributes {stable_mosaic.version = 11 : i64} {
  func.func @_bmm_kernel(%arg0: i32, %arg1: memref<10x6x7xf32, #tpu.memory_space<vmem>>, %arg2: memref<10x7x6xf32, #tpu.memory_space<vmem>>, %arg3: memref<10x6x6xf32, #tpu.memory_space<vmem>>) attributes {dimension_semantics = [#tpu.dimension_semantics<parallel>], iteration_bounds = array<i64: 2>, scalar_prefetch = 0 : i64, scratch_operands = 0 : i64, tpu.core_type = #tpu.core_type<tc>, window_params = [{transform_indices = @transform_0, window_bounds = array<i64: 10, 6, 7>}, {transform_indices = @transform_1, window_bounds = array<i64: 10, 7, 6>}, {transform_indices = @transform_2, window_bounds = array<i64: 10, 6, 6>}]} {
    %c0 = arith.constant 0 : index
    %c0_0 = arith.constant 0 : index
    %c0_1 = arith.constant 0 : index
    %0 = vector.load %arg1[%c0, %c0_0, %c0_1] : memref<10x6x7xf32, #tpu.memory_space<vmem>>, vector<10x6x7xf32>
    %c0_2 = arith.constant 0 : index
    %c0_3 = arith.constant 0 : index
    %c0_4 = arith.constant 0 : index
    %1 = vector.load %arg2[%c0_2, %c0_3, %c0_4] : memref<10x7x6xf32, #tpu.memory_space<vmem>>, vector<10x7x6xf32>
    "tpu.trace_start"() <{level = 10 : i32, message = "bmk,bkn->bmn"}> : () -> ()
    %cst = arith.constant dense<0.000000e+00> : vector<10x6x6xf32>
    %2 = tpu.matmul %0, %1, %cst {dimension_numbers = #tpu.dot_dimension_numbers<[2], [1], [1], [2], [0, 0, 0, 1, 1, 2], [0], [0]>} : vector<10x6x7xf32>, vector<10x7x6xf32>, vector<10x6x6xf32> -> vector<10x6x6xf32>
    "tpu.trace_stop"() : () -> ()
    %c0_5 = arith.constant 0 : index
    %c0_6 = arith.constant 0 : index
    %c0_7 = arith.constant 0 : index
    %3 = vector.load %arg3[%c0_5, %c0_6, %c0_7] : memref<10x6x6xf32, #tpu.memory_space<vmem>>, vector<10x6x6xf32>
    tpu.vector_store %arg3[%c0_5, %c0_6, %c0_7], %2 {strides = array<i32>} : memref<10x6x6xf32, #tpu.memory_space<vmem>>, vector<10x6x6xf32>,
    return
  }
  func.func @transform_0(%arg0: i32) -> (i32, i32, i32) {
    %c0_i32 = arith.constant 0 : i32
    %c0_i32_0 = arith.constant 0 : i32
    %c0_i32_1 = arith.constant 0 : i32
    return %arg0, %c0_i32, %c0_i32_0 : i32, i32, i32
  }
  func.func @transform_1(%arg0: i32) -> (i32, i32, i32) {
    %c0_i32 = arith.constant 0 : i32
    %c0_i32_0 = arith.constant 0 : i32
    %c0_i32_1 = arith.constant 0 : i32
    return %arg0, %c0_i32, %c0_i32_0 : i32, i32, i32
  }
  func.func @transform_2(%arg0: i32) -> (i32, i32, i32) {
    %c0_i32 = arith.constant 0 : i32
    %c0_i32_0 = arith.constant 0 : i32
    %c0_i32_1 = arith.constant 0 : i32
    return %arg0, %c0_i32, %c0_i32_0 : i32, i32, i32
  }
}

</mosaic_0001>

<bundles_post_ra>
// kernel: matmul_4d.1
= control target key start
LH: loop header
LB: loop body
LE: loop exit
PB: predicated region body
PF: predicated region fallthrough
CT: control target
= control target key end

     0   :  { %s1165_s9 = smov 0   ;;  %s1274_s0 = inlined_call_operand.vmem [shape: f32[20,6,7], index: 0, kind: input, shape index: {}]   ;;  %s1275_s1 = inlined_call_operand.vmem [shape: f32[20,7,6], index: 1, kind: input, shape index: {}]   ;;  %s1276_s2 = inlined_call_operand.vmem [shape: f32[20,6,6], index: 2, kind: output, shape index: {}]  }
   0x1 LB: > { %s1030_s10 = sadd.s32 4294967295, %s1146_s9   ;;  %p1034_p0 = scmp.ge.s32.totalorder %s1146_s9, 1  ;;  %s1146_s9 = sphi %s1165_s9, %s12_s9  }
   0x2   : > { %p124_p1 = scmp.lt.s32.totalorder %s1146_s9, 3 }
   0x4   : > { %p125_p2 = pnand %p1034_p0, %p124_p1 }
   0x5   : > { %s151_s11 = smul.u32 (!%p125_p2), 10, %s1030_s10  ;;  %v1148_v0 = vmov (!%p125_p2), 0.0   ;;  %vm1149_vm0 = vmmov (!%p125_p2), 0   ;;  %vm193_vm1 = vcmask (!%p125_p2), 1046528   ;;  %vm189_vm2 = vcmask (!%p125_p2), 56320  }
   0x6   : > { %128 = sbr.rel (%p125_p2) target bundleno = 247 (0xf7), region = 28  ;;  %1080 = vmatprep.subr.mxu0 (!%p125_p2), %v1148_v0  ;;  %1085 = vmatprep.subr.mxu1 (!%p125_p2), %v1148_v0  ;;  %vm951_vm3 = vcmask (!%p125_p2), 46080  }
   0x7   : > { %p152_p3 = scmp.lt.s32.totalorder (!%p125_p2), %s151_s11, 19  ;;  %1082 = vmatprep.mubr.msk.f32.mxu0 (!%p125_p2), %vm1149_vm0, %v1148_v0  ;;  %1087 = vmatprep.mubr.msk.f32.mxu1 (!%p125_p2), %vm1149_vm0, %v1148_v0 }
   0xd   : > { %s1278_s11 = smov (!%p152_p3, %s151_s11), 19 }
   0xe   : > { %s1179_s12 = sshll.u32 %s1278_s11, 3 }
   0xf   : > { %s1185_s15 = scalar_lea.vmem %s1275_s1, %s1179_s12  ;;  %s1191_s18 = scalar_lea.vmem %s1274_s0, %s1179_s12 }
  0x10   : > { %v179_v1 = vld [vmem:[%s1185_s15] sm:$0x7f]  ;;  %v180_v2 = vld [vmem:[%s1185_s15 + $0x8] sm:$0x7f]  ;;  %v181_v5 = vld [vmem:[%s1185_s15 + $0x10] sm:$0x7f]  ;;  %s167_s21 = scalar_lea.vmem %s1276_s2, %s1179_s12 }
  0x11   : > { %v169_v3 = vld [vmem:[%s1191_s18] sm:$0x3f]  ;;  %1081 = vmatpush3.msk.msra.mxu0 %vm193_vm1, %v179_v1  ;;  %1086 = vmatpush3.msk.msra.mxu1 %vm193_vm1, %v180_v2  ;;  %v170_v4 = vld [vmem:[%s1191_s18 + $0x8] sm:$0x3f]  ;;  %v182_v6 = vld [vmem:[%s1185_s15 + $0x18] sm:$0x7f] }
  0x12   : > { %1083 = vmatmul.mubr.msk.f32.vlgmr.msra.gmra.mrb[0].mxu0 %vm189_vm2, %v169_v3  ;;  %1088 = vmatmul.mubr.msk.f32.vlgmr.msra.gmra.mrb[0].mxu1 %vm189_vm2, %v170_v4  ;;  %v171_v7 = vld [vmem:[%s1191_s18 + $0x10] sm:$0x3f]  ;;  %v172_v8 = vld [vmem:[%s1191_s18 + $0x18] sm:$0x3f]  ;;  %v183_v9 = vld [vmem:[%s1185_s15 + $0x20] sm:$0x7f] }
  0x13   : > { %1090 = vmatprep.subr.mxu0 %v1148_v0  ;;  %1095 = vmatprep.subr.mxu1 %v1148_v0  ;;  %v184_v10 = vld [vmem:[%s1185_s15 + $0x28] sm:$0x7f]  ;;  %v173_v11 = vld [vmem:[%s1191_s18 + $0x20] sm:$0x3f]  ;;  %v185_v13 = vld [vmem:[%s1185_s15 + $0x30] sm:$0x7f] }
  0x14   : > { %1091 = vmatpush3.msk.msra.mxu0 %vm193_vm1, %v181_v5  ;;  %1096 = vmatpush3.msk.msra.mxu1 %vm193_vm1, %v182_v6  ;;  %v174_v12 = vld [vmem:[%s1191_s18 + $0x28] sm:$0x3f]  ;;  %v186_v14 = vld [vmem:[%s1185_s15 + $0x38] sm:$0x7f]  ;;  %v175_v15 = vld [vmem:[%s1191_s18 + $0x30] sm:$0x3f] }
  0x15   : > { %1092 = vmatprep.mubr.msk.f32.mxu0 %vm1149_vm0, %v1148_v0  ;;  %1097 = vmatprep.mubr.msk.f32.mxu1 %vm1149_vm0, %v1148_v0  ;;  %v176_v16 = vld [vmem:[%s1191_s18 + $0x38] sm:$0x3f]  ;;  %v187_v17 = vld [vmem:[%s1185_s15 + $0x40] sm:$0x7f]  ;;  %v188_v18 = vld [vmem:[%s1185_s15 + $0x48] sm:$0x7f] }
  0x16   : > { %1093 = vmatmul.mubr.msk.f32.vlgmr.msra.gmra.mrb[2].mxu0 %vm189_vm2, %v171_v7  ;;  %1098 = vmatmul.mubr.msk.f32.vlgmr.msra.gmra.mrb[2].mxu1 %vm189_vm2, %v172_v8  ;;  %v177_v19 = vld [vmem:[%s1191_s18 + $0x40] sm:$0x3f]  ;;  %v178_v20 = vld [vmem:[%s1191_s18 + $0x48] sm:$0x3f] }
  0x17   : > { %1100 = vmatprep.subr.mxu0 %v1148_v0  ;;  %1105 = vmatprep.subr.mxu1 %v1148_v0 }
  0x18   : > { %1101 = vmatpush3.msk.msra.mxu0 %vm193_vm1, %v183_v9  ;;  %1106 = vmatpush3.msk.msra.mxu1 %vm193_vm1, %v184_v10 }
  0x19   : > { %1102 = vmatprep.mubr.msk.f32.mxu0 %vm1149_vm0, %v1148_v0  ;;  %1107 = vmatprep.mubr.msk.f32.mxu1 %vm1149_vm0, %v1148_v0 }
  0x1a   : > { %1103 = vmatmul.mubr.msk.f32.vlgmr.msra.gmra.mrb[4].mxu0 %vm189_vm2, %v173_v11  ;;  %1108 = vmatmul.mubr.msk.f32.vlgmr.msra.gmra.mrb[4].mxu1 %vm189_vm2, %v174_v12 }
  0x1b   : > { %1110 = vmatprep.subr.mxu0 %v1148_v0  ;;  %1115 = vmatprep.subr.mxu1 %v1148_v0 }
  0x1c   : > { %1111 = vmatpush3.msk.msra.mxu0 %vm193_vm1, %v185_v13  ;;  %1116 = vmatpush3.msk.msra.mxu1 %vm193_vm1, %v186_v14 }
  0x1d   : > { %1112 = vmatprep.mubr.msk.f32.mxu0 %vm1149_vm0, %v1148_v0  ;;  %1117 = vmatprep.mubr.msk.f32.mxu1 %vm1149_vm0, %v1148_v0 }
  0x1e   : > { %1113 = vmatmul.mubr.msk.f32.vlgmr.msra.gmra.mrb[6].mxu0 %vm189_vm2, %v175_v15  ;;  %1118 = vmatmul.mubr.msk.f32.vlgmr.msra.gmra.mrb[6].mxu1 %vm189_vm2, %v176_v16 }
  0x1f   : > { %1120 = vmatprep.subr.mxu0 %v1148_v0  ;;  %1125 = vmatprep.subr.mxu1 %v1148_v0 }
  0x20   : > { %1121 = vmatpush3.msk.msra.mxu0 %vm193_vm1, %v187_v17  ;;  %1126 = vmatpush3.msk.msra.mxu1 %vm193_vm1, %v188_v18 }
  0x21   : > { %1122 = vmatprep.mubr.msk.f32.mxu0 %vm1149_vm0, %v1148_v0  ;;  %1127 = vmatprep.mubr.msk.f32.mxu1 %vm1149_vm0, %v1148_v0 }
  0x22   : > { %1123 = vmatmul.mubr.msk.f32.vlgmr.msra.gmra.mrb[8].mxu0 %vm189_vm2, %v177_v19  ;;  %1128 = vmatmul.mubr.msk.f32.vlgmr.msra.gmra.mrb[8].mxu1 %vm189_vm2, %v178_v20 }
  0xe5   : > { %v263_v21 = vpop.f32.mrb[0].mxu0  ;;  %v339_v22 = vpop.f32.mrb[0].mxu1 }
  0xe6   : > { %952 = vst.msk [vmem:[%s167_s21] sm:$0x3f] %vm951_vm3, %v263_v21  ;;  %953 = vst.msk [vmem:[%s167_s21 + $0x8] sm:$0x3f] %vm951_vm3, %v339_v22  ;;  %v1084_v23 = vpop.f32.mrb[1].mxu0  ;;  %v1089_v24 = vpop.f32.mrb[1].mxu1 }
  0xe9   : > { %v415_v25 = vpop.f32.mrb[2].mxu0  ;;  %v491_v26 = vpop.f32.mrb[2].mxu1 }
  0xea   : > { %954 = vst.msk [vmem:[%s167_s21 + $0x10] sm:$0x3f] %vm951_vm3, %v415_v25  ;;  %955 = vst.msk [vmem:[%s167_s21 + $0x18] sm:$0x3f] %vm951_vm3, %v491_v26  ;;  %v1094_v27 = vpop.f32.mrb[3].mxu0  ;;  %v1099_v28 = vpop.f32.mrb[3].mxu1 }
  0xed   : > { %v567_v29 = vpop.f32.mrb[4].mxu0  ;;  %v643_v30 = vpop.f32.mrb[4].mxu1 }
  0xee   : > { %956 = vst.msk [vmem:[%s167_s21 + $0x20] sm:$0x3f] %vm951_vm3, %v567_v29  ;;  %957 = vst.msk [vmem:[%s167_s21 + $0x28] sm:$0x3f] %vm951_vm3, %v643_v30  ;;  %v1104_v31 = vpop.f32.mrb[5].mxu0  ;;  %v1109_v32 = vpop.f32.mrb[5].mxu1 }
  0xf1   : > { %v719_v33 = vpop.f32.mrb[6].mxu0  ;;  %v795_v34 = vpop.f32.mrb[6].mxu1 }
  0xf2   : > { %958 = vst.msk [vmem:[%s167_s21 + $0x30] sm:$0x3f] %vm951_vm3, %v719_v33  ;;  %959 = vst.msk [vmem:[%s167_s21 + $0x38] sm:$0x3f] %vm951_vm3, %v795_v34  ;;  %v1114_v35 = vpop.f32.mrb[7].mxu0  ;;  %v1119_v36 = vpop.f32.mrb[7].mxu1 }
  0xf5   : > { %v871_v37 = vpop.f32.mrb[8].mxu0  ;;  %v947_v38 = vpop.f32.mrb[8].mxu1 }
  0xf6   : > { %960 = vst.msk [vmem:[%s167_s21 + $0x40] sm:$0x3f] %vm951_vm3, %v871_v37  ;;  %961 = vst.msk [vmem:[%s167_s21 + $0x48] sm:$0x3f] %vm951_vm3, %v947_v38  ;;  %v1124_v39 = vpop.f32.mrb[9].mxu0  ;;  %v1129_v40 = vpop.f32.mrb[9].mxu1 }
  0xf7 PF: > { %s12_s9 = sadd.s32 1, %s1146_s9  }
  0xf8   : > { %p9_p4 = scmp.ge.s32.totalorder %s12_s9, 4  }
  0xfa   :  { %11 = sbr.rel (!%p9_p4) target bundleno = 1 (0x1), region = 61 }

</bundles_post_ra>
